<compile_context>
chip_gen: v7x
topology: tpu7x:2x2x1
jax: 0.10.0
libtpu: 0.0.40
codegen_flags: <defaults>
</compile_context>

<pallas_src>
import functools

import jax
import jax.numpy as jnp
from jax.experimental import pallas as pl
from jax.experimental.pallas import tpu as pltpu


def _row_kl(ys_ref, yt_ref, T):
    """(TB, 1) per-row KL(p_t || p_s) * T^2 for one batch tile."""
    inv_T = 1.0 / T
    ys = ys_ref[...].astype(jnp.float32) * inv_T
    yt = yt_ref[...].astype(jnp.float32) * inv_T

    ys_shift = ys - jnp.max(ys, axis=-1, keepdims=True)
    yt_shift = yt - jnp.max(yt, axis=-1, keepdims=True)

    e_t = jnp.exp(yt_shift)
    z_t = jnp.sum(e_t, axis=-1, keepdims=True)                 # (TB, 1)
    z_s = jnp.sum(jnp.exp(ys_shift), axis=-1, keepdims=True)   # (TB, 1)

    # sum_c p_t * (log p_t - log p_s)
    #   = (1/z_t) * sum_c e_t * (yt_shift - ys_shift) + log(z_s / z_t)
    num = jnp.sum(e_t * (yt_shift - ys_shift), axis=-1, keepdims=True)
    # Exact reciprocal on (TB, 1) elements only; keeps tight f32 parity with
    # the PyTorch reference (approx=True would also be fine and lands on EUP).
    row = num * pl.reciprocal(z_t, approx=False) + jnp.log(z_s / z_t)
    return row * (T * T)


def _kl_rows_kernel(ys_ref, yt_ref, row_ref, *, T):
    """is_ca=True path: per-sample loss rows."""
    row_ref[...] = _row_kl(ys_ref, yt_ref, T)


def _kl_sum_kernel(ys_ref, yt_ref, acc_ref, *, T):
    """is_ca=False path: in-kernel scalar accumulation across batch tiles."""
    @pl.when(pl.program_id(0) == 0)
    def _():
        acc_ref[...] = jnp.zeros_like(acc_ref)

    acc_ref[...] += jnp.sum(_row_kl(ys_ref, yt_ref, T), keepdims=True)


def _pick_block_rows(B, C, in_itemsize, vmem_budget_bytes=8 << 20):
    """Largest multiple-of-8 row tile whose double-buffered inputs fit budget."""
    # 2 inputs x 2 pipeline buffers x TB x C x max(itemsize, 4) <= budget
    tb = vmem_budget_bytes // (4 * C * max(int(in_itemsize), 4))
    tb = max(8, (tb // 8) * 8)
    tb = min(tb, 512)                    # keep f32 intermediates modest (v7x: 64 MiB VMEM)
    tb = min(tb, ((B + 7) // 8) * 8)     # never bigger than the (padded) batch
    return tb


def distill_kl(y_s, y_t, T, is_ca=False, *, block_rows=None):
    """Pallas implementation of DistillKL.forward for (B, C) logits."""
    assert y_s.shape == y_t.shape and y_s.ndim == 2, "expect (B, C) logits"
    B, C = y_s.shape
    T = float(T)

    itemsize = jnp.dtype(y_s.dtype).itemsize
    TB = block_rows if block_rows is not None else _pick_block_rows(B, C, itemsize)
    assert TB % 8 == 0, "row tile must be a multiple of the f32 sublane count"

    n_tiles = pl.cdiv(B, TB)
    B_pad = n_tiles * TB
    if B_pad != B:
        # Zero rows => identical student/teacher distributions => KL == 0,
        # so padding is exact for both reduction modes.
        pad = ((0, B_pad - B), (0, 0))
        y_s = jnp.pad(y_s, pad)
        y_t = jnp.pad(y_t, pad)

    in_specs = [
        pl.BlockSpec((TB, C), lambda i: (i, 0)),
        pl.BlockSpec((TB, C), lambda i: (i, 0)),
    ]
    vmem_limit = 32 * 1024 * 1024   # safe on v7x (64 MiB VMEM), ample for these tiles

    if is_ca:
        rows = pl.pallas_call(
            functools.partial(_kl_rows_kernel, T=T),
            out_shape=jax.ShapeDtypeStruct((B_pad, 1), jnp.float32),
            grid_spec=pltpu.PrefetchScalarGridSpec(
                num_scalar_prefetch=0,
                grid=(n_tiles,),
                in_specs=in_specs,
                out_specs=pl.BlockSpec((TB, 1), lambda i: (i, 0)),
            ),
            compiler_params=pltpu.CompilerParams(
                dimension_semantics=("parallel",),
                vmem_limit_bytes=vmem_limit,
            ),
        )(y_s, y_t)
        # KLDivLoss(reduction='none') * T^2, summed over classes -> (B,)
        return rows[:B, 0]

    total = pl.pallas_call(
        functools.partial(_kl_sum_kernel, T=T),
        out_shape=jax.ShapeDtypeStruct((1, 1), jnp.float32),
        grid_spec=pltpu.PrefetchScalarGridSpec(
            num_scalar_prefetch=0,
            grid=(n_tiles,),
            in_specs=in_specs,
            # same (1,1) block revisited across the whole grid -> accumulator
            out_specs=pl.BlockSpec((1, 1), lambda i: (0, 0)),
        ),
        compiler_params=pltpu.CompilerParams(
            dimension_semantics=("arbitrary",),
            vmem_limit_bytes=vmem_limit,
        ),
    )(y_s, y_t)
    # KLDivLoss(reduction='batchmean') * T^2 -> scalar (divide by original B)
    return total[0, 0] / B


def _reference(y_s, y_t, T, is_ca=False):
    y_s = y_s.astype(jnp.float32)
    y_t = y_t.astype(jnp.float32)
    log_p_s = jax.nn.log_softmax(y_s / T, axis=1)
    p_t = jax.nn.softmax(y_t / T, axis=1)
    kl = p_t * (jnp.log(p_t) - log_p_s)
    if is_ca:
        return (kl * T * T).sum(-1)
    return kl.sum() / y_s.shape[0] * T * T


if __name__ == "__main__":
    T = 4.0
    key = jax.random.PRNGKey(0)

    # (B, C, block_rows, dtype): single-tile, tile-friendly, multi-tile+padding,
    # and a bf16 case (native-dtype ingestion, in-kernel f32 math).
    configs = [
        (6, 100, None, jnp.float32),
        (8, 128, None, jnp.float32),
        (40, 256, 16, jnp.float32),
        (16, 128, None, jnp.bfloat16),
    ]
    for B, C, block_rows, dtype in configs:
        key, k_s, k_t = jax.random.split(key, 3)
        y_s = jax.random.normal(k_s, (B, C), dtype=jnp.float32).astype(dtype)
        y_t = jax.random.normal(k_t, (B, C), dtype=jnp.float32).astype(dtype)

        got_bm = jax.block_until_ready(
            distill_kl(y_s, y_t, T, is_ca=False, block_rows=block_rows))
        got_ca = jax.block_until_ready(
            distill_kl(y_s, y_t, T, is_ca=True, block_rows=block_rows))

        ref_bm = _reference(y_s, y_t, T, is_ca=False)
        ref_ca = _reference(y_s, y_t, T, is_ca=True)

        assert got_ca.shape == (B,)
        assert jnp.allclose(got_bm, ref_bm, rtol=1e-4, atol=1e-5), (B, C, got_bm, ref_bm)
        assert jnp.allclose(got_ca, ref_ca, rtol=1e-4, atol=1e-5), (B, C, got_ca, ref_ca)

    print("KERNEL_OK")
</pallas_src>

<mosaic_0001>
module attributes {stable_mosaic.version = 11 : i64} {
  func.func @_kl_sum_kernel(%arg0: i32, %arg1: memref<8x100xf32, #tpu.memory_space<vmem>>, %arg2: memref<8x100xf32, #tpu.memory_space<vmem>>, %arg3: memref<1x1xf32, #tpu.memory_space<vmem>>) attributes {dimension_semantics = [#tpu.dimension_semantics<arbitrary>], iteration_bounds = array<i64: 1>, scalar_prefetch = 0 : i64, scratch_operands = 0 : i64, tpu.core_type = #tpu.core_type<tc>, window_params = [{transform_indices = @transform_0, window_bounds = array<i64: 8, 100>}, {transform_indices = @transform_1, window_bounds = array<i64: 8, 100>}, {pipeline_mode = #tpu.pipeline_mode<synchronous>, transform_indices = @transform_2, window_bounds = array<i64: 1, 1>}]} {
    %c0_i32 = arith.constant 0 : i32
    %0 = arith.cmpi eq, %arg0, %c0_i32 : i32
    %1 = arith.extui %0 : i1 to i32
    %c0_i32_0 = arith.constant 0 : i32
    %2 = arith.cmpi ne, %1, %c0_i32_0 : i32
    scf.if %2 {
      %cst_16 = arith.constant 0.000000e+00 : f32
      %42 = vector.broadcast %cst_16 : f32 to vector<1x1xf32>
      %c0_17 = arith.constant 0 : index
      %c0_18 = arith.constant 0 : index
      %43 = vector.load %arg3[%c0_17, %c0_18] : memref<1x1xf32, #tpu.memory_space<vmem>>, vector<1x1xf32>
      tpu.vector_store %arg3[%c0_17, %c0_18], %42 {strides = array<i32>} : memref<1x1xf32, #tpu.memory_space<vmem>>, vector<1x1xf32>,
    } else {
    }
    %c0 = arith.constant 0 : index
    %c0_1 = arith.constant 0 : index
    %3 = vector.load %arg3[%c0, %c0_1] : memref<1x1xf32, #tpu.memory_space<vmem>>, vector<1x1xf32>
    %c0_2 = arith.constant 0 : index
    %c0_3 = arith.constant 0 : index
    %4 = vector.load %arg1[%c0_2, %c0_3] : memref<8x100xf32, #tpu.memory_space<vmem>>, vector<8x100xf32>
    %cst = arith.constant 2.500000e-01 : f32
    %5 = vector.broadcast %cst : f32 to vector<8x100xf32>
    %6 = arith.mulf %4, %5 : vector<8x100xf32>
    %c0_4 = arith.constant 0 : index
    %c0_5 = arith.constant 0 : index
    %7 = vector.load %arg2[%c0_4, %c0_5] : memref<8x100xf32, #tpu.memory_space<vmem>>, vector<8x100xf32>
    %cst_6 = arith.constant 2.500000e-01 : f32
    %8 = vector.broadcast %cst_6 : f32 to vector<8x100xf32>
    %9 = arith.mulf %7, %8 : vector<8x100xf32>
    %cst_7 = arith.constant dense<0xFF800000> : vector<8xf32>
    %10 = vector.multi_reduction <maximumf>, %6, %cst_7 [1] : vector<8x100xf32> to vector<8xf32>
    %11 = vector.shape_cast %10 : vector<8xf32> to vector<8x1xf32>
    %12 = vector.broadcast %11 : vector<8x1xf32> to vector<8x100xf32>
    %13 = arith.subf %6, %12 : vector<8x100xf32>
    %cst_8 = arith.constant dense<0xFF800000> : vector<8xf32>
    %14 = vector.multi_reduction <maximumf>, %9, %cst_8 [1] : vector<8x100xf32> to vector<8xf32>
    %15 = vector.shape_cast %14 : vector<8xf32> to vector<8x1xf32>
    %16 = vector.broadcast %15 : vector<8x1xf32> to vector<8x100xf32>
    %17 = arith.subf %9, %16 : vector<8x100xf32>
    %18 = math.exp %17 : vector<8x100xf32>
    %cst_9 = arith.constant dense<0.000000e+00> : vector<8xf32>
    %19 = vector.multi_reduction <add>, %18, %cst_9 [1] : vector<8x100xf32> to vector<8xf32>
    %20 = vector.shape_cast %19 : vector<8xf32> to vector<8x1xf32>
    %21 = math.exp %13 : vector<8x100xf32>
    %cst_10 = arith.constant dense<0.000000e+00> : vector<8xf32>
    %22 = vector.multi_reduction <add>, %21, %cst_10 [1] : vector<8x100xf32> to vector<8xf32>
    %23 = vector.shape_cast %22 : vector<8xf32> to vector<8x1xf32>
    %24 = arith.subf %17, %13 : vector<8x100xf32>
    %25 = arith.mulf %18, %24 : vector<8x100xf32>
    %cst_11 = arith.constant dense<0.000000e+00> : vector<8xf32>
    %26 = vector.multi_reduction <add>, %25, %cst_11 [1] : vector<8x100xf32> to vector<8xf32>
    %27 = vector.shape_cast %26 : vector<8xf32> to vector<8x1xf32>
    %28 = tpu.reciprocal %20 : vector<8x1xf32> -> vector<8x1xf32>
    %29 = arith.mulf %27, %28 : vector<8x1xf32>
    %30 = arith.divf %23, %20 : vector<8x1xf32>
    %31 = math.log %30 : vector<8x1xf32>
    %32 = arith.addf %29, %31 : vector<8x1xf32>
    %cst_12 = arith.constant 1.600000e+01 : f32
    %33 = vector.broadcast %cst_12 : f32 to vector<8x1xf32>
    %34 = arith.mulf %32, %33 : vector<8x1xf32>
    %35 = vector.shape_cast %34 : vector<8x1xf32> to vector<1x8x1xf32>
    %cst_13 = arith.constant dense<0.000000e+00> : vector<1xf32>
    %36 = vector.multi_reduction <add>, %35, %cst_13 [1, 2] : vector<1x8x1xf32> to vector<1xf32>
    %37 = vector.shape_cast %36 : vector<1xf32> to vector<1x1x1xf32>
    %38 = vector.extract %37[0, 0, 0] : f32 from vector<1x1x1xf32>
    %39 = vector.broadcast %38 : f32 to vector<1x1xf32>
    %40 = arith.addf %3, %39 : vector<1x1xf32>
    %c0_14 = arith.constant 0 : index
    %c0_15 = arith.constant 0 : index
    %41 = vector.load %arg3[%c0_14, %c0_15] : memref<1x1xf32, #tpu.memory_space<vmem>>, vector<1x1xf32>
    tpu.vector_store %arg3[%c0_14, %c0_15], %40 {strides = array<i32>} : memref<1x1xf32, #tpu.memory_space<vmem>>, vector<1x1xf32>,
    return
  }
  func.func @transform_0(%arg0: i32) -> (i32, i32) {
    %c0_i32 = arith.constant 0 : i32
    %c0_i32_0 = arith.constant 0 : i32
    return %arg0, %c0_i32 : i32, i32
  }
  func.func @transform_1(%arg0: i32) -> (i32, i32) {
    %c0_i32 = arith.constant 0 : i32
    %c0_i32_0 = arith.constant 0 : i32
    return %arg0, %c0_i32 : i32, i32
  }
  func.func @transform_2(%arg0: i32) -> (i32, i32) {
    %c0_i32 = arith.constant 0 : i32
    %c0_i32_0 = arith.constant 0 : i32
    %c0_i32_1 = arith.constant 0 : i32
    return %c0_i32, %c0_i32_0 : i32, i32
  }
}

</mosaic_0001>

<bundles_post_ra>
// kernel: tpu_custom_call.1
= control target key start
LH: loop header
LB: loop body
LE: loop exit
PB: predicated region body
PF: predicated region fallthrough
CT: control target
= control target key end

     0   :  { %7 = vsyncpa [#allocation3], 0  ;;  %s257_s0 = inlined_call_operand.hbm [shape: f32[8,100], index: 0, kind: input, shape index: {}]   ;;  %s258_s1 = inlined_call_operand.hbm [shape: f32[8,100], index: 1, kind: input, shape index: {}]   ;;  %s259_s2 = inlined_call_operand.hbm [shape: f32[1,1], index: 2, kind: output, shape index: {}]  }
   0x1   :  { %8 = vsyncpa [#allocation6], 0 }
   0x2   :  { %9 = vsyncpa [#allocation4], 0  ;;  %s195_s9 = smov [#allocation2]   ;;  %s196_s11 = smov [#allocation5]  }
   0x3   :  { %s16_s10 = sshll.u32 %s195_s9, 4  ;;  %s26_s12 = sshll.u32 %s196_s11, 4  ;;  %s17_s10 = int_to_ptr.vmem [resolvable:$true] %s16_s10  ;;  %s27_s12 = int_to_ptr.vmem [resolvable:$true] %s26_s12 }
   0x4   :  { %s123_s15 = scalar_lea.hbm %s257_s0, 128 }
   0x5   :  { %p124_p0 = scmp.ne.s32.totalorder %s257_s0, %s123_s15  ;;  %p127_p1 = scmp.lt.u32.totalorder %s123_s15, %s257_s0 }
   0x7   :  { %p129_p2 = pnand %p127_p1, %p124_p0 }
   0x9   :  { %132 = shalt.err (!%p129_p2)
}
   0xa   :  { %s133_s20 = scalar_lea.vmem %s17_s10, 128  ;;  %p138_p4 = scmp.lt.s32.totalorder %s17_s10, %s17_s10 }
   0xb   :  { %p134_p3 = scmp.ne.s32.totalorder %s17_s10, %s133_s20  ;;  %p139_p5 = scmp.lt.s32.totalorder %s133_s20, %s133_s20 }
   0xd   :  { %p140_p6 = por %p139_p5, %p138_p4 }
   0xf   :  { %p141_p7 = pnand %p140_p6, %p134_p3 }
  0x11   :  { %144 = shalt.err (!%p141_p7)
}
  0x12   :  { %19 = dma.hbm_to_vmem [thread:$0]  %s257_s0, 128, %s17_s10, [#allocation3]  }
  0x13   :  { %s145_s25 = scalar_lea.hbm %s258_s1, 128 }
  0x14   :  { %p146_p8 = scmp.ne.s32.totalorder %s258_s1, %s145_s25  ;;  %p149_p9 = scmp.lt.u32.totalorder %s145_s25, %s258_s1 }
  0x16   :  { %p151_p10 = pnand %p149_p9, %p146_p8 }
  0x18   :  { %154 = shalt.err (!%p151_p10)
}
  0x19   :  { %s155_s30 = scalar_lea.vmem %s27_s12, 128  ;;  %p160_p12 = scmp.lt.s32.totalorder %s27_s12, %s27_s12 }
  0x1a   :  { %p156_p11 = scmp.ne.s32.totalorder %s27_s12, %s155_s30  ;;  %p161_p13 = scmp.lt.s32.totalorder %s155_s30, %s155_s30 }
  0x1c   :  { %p162_p0 = por %p161_p13, %p160_p12 }
  0x1e   :  { %p163_p1 = pnand %p162_p0, %p156_p11 }
  0x20   :  { %166 = shalt.err (!%p163_p1)
}
  0x21   :  { %29 = dma.hbm_to_vmem [thread:$0]  %s258_s1, 128, %s27_s12, [#allocation6]  }
  0x22   :  { %189 = dma.done.wait [#allocation3], 128  }
  0x23   :  { %190 = vsyncadd [#allocation3], 4294967168 }
  0x24   :  { %191 = dma.done.wait [#allocation6], 128  }
  0x25   :  { %192 = vsyncadd [#allocation6], 4294967168  ;;  %vm40_vm0 = vcmask 0   ;;  %v197_v0 = vmov 0.0   ;;  %v45_v1 = vld [vmem:[#allocation5] sm:$0xff]  ;;  %vm47_vm1 = vcmask 818176  }
  0x26   :  { %41 = vst.msk [vmem:[#allocation7] sm:$0x1] %vm40_vm0, %v197_v0  ;;  %v43_v2 = vld [vmem:[#allocation2] sm:$0xff]  ;;  %v46_v3 = vmul.f32 0.25, %v45_v1  ;;  %vm78_vm2 = vcmask 7168   ;;  %s198_s1 = smov [#allocation7]  }
  0x27   :  { %v44_v4 = vmul.f32 0.25, %v43_v2  ;;  %s99_s4 = sshll.u32 %s198_s1, 4  ;;  %s100_s4 = int_to_ptr.vmem [resolvable:$true] %s99_s4 }
  0x28   :  { %v52_v5 = vsel %vm47_vm1, %v46_v3, -inf  ;;  %s167_s6 = scalar_lea.vmem %s100_s4, 16  ;;  %s171_s7 = scalar_lea.vmem %s100_s4, 32 }
  0x29   :  { %53 = vmax.xlane.f32.xlu0 %v52_v5  ;;  %v48_v6 = vsel %vm47_vm1, %v44_v4, -inf  ;;  %p168_p2 = scmp.ne.s32.totalorder %s100_s4, %s167_s6  ;;  %p172_p3 = scmp.lt.s32.totalorder %s100_s4, %s100_s4 }
  0x2a   :  { %p173_p4 = scmp.lt.s32.totalorder %s171_s7, %s167_s6 }
  0x2c   :  { %p174_p5 = por %p173_p4, %p172_p3 }
  0x2d   :  { %49 = vmax.xlane.f32.xlu0 %v48_v6  ;;  %v42_v38 = vld [vmem:[#allocation7] sm:$0x1] }
  0x2e   :  { %p175_p6 = pnand %p174_p5, %p168_p2 }
  0xb6   :  { %v54_v7 = vpop.xlane.xlu0 %53 }
  0xb7   :  { %v55_v8 = vsub.f32 %v46_v3, %v54_v7 }
  0xb9   :  { %v56_v9 = vmul.f32 1.442695, %v55_v8 }
  0xba   :  { %v50_v10 = vpop.xlane.xlu0 %49 }
  0xbb   :  { %115 = vpow2.f32 %v56_v9  ;;  %v51_v11 = vsub.f32 %v44_v4, %v50_v10 }
  0xbd   :  { %v61_v12 = vmul.f32 1.442695, %v51_v11  ;;  %v66_v13 = vsub.f32 %v55_v8, %v51_v11 }
  0xbf   :  { %117 = vpow2.f32 %v61_v12 }
  0xc5   :  { %v116_v14 = vpop.eup %115 }
  0xc6   :  { %v58_v15 = vsel %vm47_vm1, %v116_v14, 0.0  ;;  %v67_v16 = vmul.f32 %v116_v14, %v66_v13 }
  0xc7   :  { %59 = vadd.xlane.f32.xlu1 %v58_v15 }
  0xc8   :  { %v68_v17 = vsel %vm47_vm1, %v67_v16, 0.0 }
  0xc9   :  { %v118_v18 = vpop.eup %117  ;;  %69 = vadd.xlane.f32.xlu0 %v68_v17 }
  0xca   :  { %v63_v19 = vsel %vm47_vm1, %v118_v18, 0.0 }
  0xcb   :  { %64 = vadd.xlane.f32.xlu1 %v63_v19 }
 0x154   :  { %v60_v20 = vpop.xlane.xlu1 %59 }
 0x155   :  { %119 = vrcp.f32 %v60_v20 }
 0x156   :  { %v70_v25 = vpop.xlane.xlu0 %69 }
 0x158   :  { %v65_v21 = vpop.xlane.xlu1 %64 }
 0x15f   :  { %v120_v22 = vpop.eup %119 }
 0x160   :  { %v73_v23 = vmul.f32 %v120_v22, %v65_v21  ;;  %v72_v26 = vmul.f32 %v120_v22, %v70_v25 }
 0x162   :  { %121 = vlog2.f32 %v73_v23 }
 0x16c   :  { %v122_v24 = vpop.eup %121 }
 0x16d   :  { %v75_v27 = vmul.f32 0.6931472, %v122_v24 }
 0x16f   :  { %v76_v28 = vadd.f32 %v75_v27, %v72_v26 }
 0x171   :  { %v77_v29 = vmul.f32 16.0, %v76_v28 }
 0x173   :  { %v79_v30 = vsel %vm78_vm2, %v77_v29, 0.0 }
 0x174   :  { %80 = vadd.xlane.f32.xlu1 %v79_v30 }
 0x201   :  { %v81_v31 = vpop.xlane.xlu1 %80 }
 0x202   :  { %v82_v32 = vrot.slane %v81_v31, 4 }
 0x204   :  { %v83_v33 = vadd.f32 %v82_v32, %v81_v31 }
 0x206   :  { %v84_v34 = vrot.slane %v83_v33, 2 }
 0x208   :  { %v85_v35 = vadd.f32 %v84_v34, %v83_v33 }
 0x20a   :  { %v86_v36 = vrot.slane %v85_v35, 1 }
 0x20c   :  { %v87_v37 = vadd.f32 %v86_v36, %v85_v35 }
 0x20e   :  { %109 = vpush %v87_v37 }
 0x23f   :  { %s110_s5 = spop %109 }
 0x240   :  { %v89_v39 = vstv %s110_s5 }
 0x241   :  { %v90_v40 = vadd.f32 %v89_v39, %v42_v38 }
 0x243   :  { %92 = vst.msk [vmem:[#allocation7] sm:$0x1] %vm40_vm0, %v90_v40 }
 0x244   :  { %178 = shalt.err (!%p175_p6)
}
 0x245   :  { %s179_s10 = scalar_lea.hbm %s259_s2, 16 }
 0x246   :  { %p180_p7 = scmp.ne.s32.totalorder %s259_s2, %s179_s10  ;;  %p183_p8 = scmp.lt.u32.totalorder %s179_s10, %s259_s2 }
 0x248   :  { %p185_p9 = pnand %p183_p8, %p180_p7 }
 0x24a   :  { %188 = shalt.err (!%p185_p9)
}
 0x24b   :  { %102 = dma.vmem_to_hbm [thread:$0]  %s100_s4, 16, %s259_s2, [#allocation4]  }
 0x24c   :  { %193 = dma.done.wait [#allocation4], 16  }
 0x24d   :  { %194 = vsyncadd [#allocation4], 4294967280 }
 0x24e   :  { %106 = vsyncpa [#allocation3], 1 }
 0x24f   :  { %107 = vsyncpa [#allocation6], 1 }
 0x250   :  { %108 = vsyncpa [#allocation4], 1 }

</bundles_post_ra>
